<compile_context>
chip_gen: v6e
topology: v6e:2x2x1
jax: 0.10.0
libtpu: 0.0.40
codegen_flags: <defaults>
</compile_context>

<pallas_src>
import jax
import jax.numpy as jnp
from jax import lax
from jax.experimental import pallas as pl
from jax.experimental.pallas import tpu as pltpu

_MIB = 1024 * 1024


def _round_up(x, m):
    return ((x + m - 1) // m) * m


def _vmem_tile_bytes(rows, cols, itemsize):
    # VMEM blocks are physically padded to (8, 128) granules.
    return _round_up(max(rows, 1), 8) * _round_up(max(cols, 1), 128) * itemsize


def _physical_vmem_bytes():
    try:
        return int(pltpu.get_tpu_info().vmem_capacity_bytes)
    except Exception:
        return 64 * _MIB  # conservative (v7x)


def _dot_t(x, w):
    # x: (M, K), w: (N, K) -> (M, N): contract over K (x @ w.T) on the MXU.
    return lax.dot_general(
        x, w,
        dimension_numbers=(((1,), (1,)), ((), ())),
        preferred_element_type=jnp.float32,
    )


# ----------------------------- kernels ------------------------------------


def _resident_kernel(x_ref, w_ref, b_ref, o_ref):
    # x: (TM, E)  w: (C, E)  b: (1, C)  o: (TM, C)
    acc = _dot_t(x_ref[...], w_ref[...])
    o_ref[...] = jnp.abs(acc + b_ref[...]).astype(o_ref.dtype)


def _ktiled_inplace_kernel(x_ref, w_ref, b_ref, o_ref):
    # f32 output: accumulate directly into the resident output block.
    k = pl.program_id(1)
    part = _dot_t(x_ref[...], w_ref[...])

    @pl.when(k == 0)
    def _():
        o_ref[...] = part

    @pl.when(k > 0)
    def _():
        o_ref[...] += part

    @pl.when(k == pl.num_programs(1) - 1)
    def _():
        o_ref[...] = jnp.abs(o_ref[...] + b_ref[...])


def _ktiled_scratch_kernel(x_ref, w_ref, b_ref, o_ref, acc_ref):
    # Non-f32 output: f32 scratch accumulator, cast once in the epilogue.
    k = pl.program_id(1)

    @pl.when(k == 0)
    def _():
        acc_ref[...] = jnp.zeros_like(acc_ref)

    acc_ref[...] += _dot_t(x_ref[...], w_ref[...])

    @pl.when(k == pl.num_programs(1) - 1)
    def _():
        o_ref[...] = jnp.abs(acc_ref[...] + b_ref[...]).astype(o_ref.dtype)


# ----------------------------- wrapper -------------------------------------


def _pick_batch_tile(B, tm_request, tm_cap):
    """Pick (tm, B_pad): largest tile with small padding waste, >=2 tiles."""
    B8 = _round_up(B, 8)
    cap = max(8, min(tm_request, tm_cap))
    waste_budget = max(B8 // 8, 8)  # <= ~12.5% padded rows
    tm, B_pad = 8, B8
    for t in (512, 384, 256, 128, 64, 32, 16, 8):
        if t > cap:
            continue
        bp = _round_up(B8, t)
        if bp - B8 <= waste_budget:
            tm, B_pad = t, bp
            break
    # v7x has 2 TensorCores sharing the "parallel" batch axis: keep >= 2 tiles.
    if B_pad // tm == 1 and B_pad >= 16:
        tm = B_pad // 2 if (B_pad // 2) % 8 == 0 else 8
    return tm, B_pad


def image_encoder(
    x,
    weight,
    bias,
    *,
    tm=512,
    tk=512,
    compute_dtype=None,
    vmem_resident_budget_bytes=None,
    vmem_limit_bytes=None,
):
    """abs(x @ weight.T + bias).

    x:      (B, E) activations
    weight: (C, E) PyTorch nn.Linear layout
    bias:   (C,)
    compute_dtype: e.g. jnp.bfloat16 for the mem-bound roofline (f32
                   accumulation and f32 bias+abs epilogue are kept);
                   None keeps the input dtype (exact f32 module semantics).
    """
    B, E = x.shape
    C, E_w = weight.shape
    assert E == E_w and bias.shape == (C,)

    out_dtype = x.dtype
    cdt = jnp.dtype(compute_dtype) if compute_dtype is not None else jnp.dtype(x.dtype)
    itemsize = cdt.itemsize
    out_itemsize = jnp.dtype(out_dtype).itemsize

    # Generation-aware VMEM budgets (v7x: 64 MiB physical; v5e/v6e: 128 MiB).
    phys_vmem = _physical_vmem_bytes()
    if vmem_limit_bytes is None:
        vmem_limit_bytes = max(32 * _MIB, min(phys_vmem - 8 * _MIB, 110 * _MIB))
    if vmem_resident_budget_bytes is None:
        vmem_resident_budget_bytes = int(0.8 * vmem_limit_bytes)

    tm_cap = 512 if phys_vmem >= 96 * _MIB else 256
    tm_eff, B_pad = _pick_batch_tile(B, tm, tm_cap)

    # Cast only when needed (avoid extra wrapper-side HBM passes).
    x_c = x if x.dtype == cdt else x.astype(cdt)
    w_c = weight if weight.dtype == cdt else weight.astype(cdt)
    b_c = bias.astype(jnp.float32).reshape(1, C)

    cost = pl.CostEstimate(
        flops=2 * B_pad * E * C,
        transcendentals=0,
        bytes_accessed=itemsize * (B_pad * E + C * E)
        + 4 * C
        + out_itemsize * B_pad * C,
    )

    # Resident fast-path VMEM estimate.  Pallas double-buffers every input
    # block by default (even constant-index ones), so weight and bias count 2x.
    resident_bytes = (
        2 * _vmem_tile_bytes(C, E, itemsize)              # weight
        + 2 * _vmem_tile_bytes(1, C, 4)                   # bias (f32)
        + 2 * _vmem_tile_bytes(tm_eff, E, itemsize)       # x tiles
        + 2 * _vmem_tile_bytes(tm_eff, C, out_itemsize)   # out tiles
    )

    if resident_bytes <= vmem_resident_budget_bytes:
        # Fast path: weight fully resident in VMEM, single parallel batch axis.
        x_p = x_c if B_pad == B else jnp.pad(x_c, ((0, B_pad - B), (0, 0)))
        out_p = pl.pallas_call(
            _resident_kernel,
            out_shape=jax.ShapeDtypeStruct((B_pad, C), out_dtype),
            grid_spec=pltpu.PrefetchScalarGridSpec(
                num_scalar_prefetch=0,
                grid=(B_pad // tm_eff,),
                in_specs=[
                    pl.BlockSpec((tm_eff, E), lambda i: (i, 0)),
                    pl.BlockSpec((C, E), lambda i: (0, 0)),
                    pl.BlockSpec((1, C), lambda i: (0, 0)),
                ],
                out_specs=pl.BlockSpec((tm_eff, C), lambda i: (i, 0)),
            ),
            compiler_params=pltpu.CompilerParams(
                dimension_semantics=("parallel",),
                vmem_limit_bytes=vmem_limit_bytes,
            ),
            cost_estimate=cost,
        )(x_p, w_c, b_c)
    else:
        # Large-weight fallback: K-tiled reduction ("arbitrary" axis).
        E_pad = _round_up(E, 128)
        n128 = E_pad // 128
        max_d = max(1, min(tk, E_pad) // 128)
        d = 1
        for cand in range(max_d, 0, -1):
            if n128 % cand == 0:       # largest 128-multiple dividing E_pad
                d = cand
                break
        tk_eff = d * 128

        pad_rows = B_pad - B
        pad_k = E_pad - E
        if pad_rows or pad_k:
            x_p = jnp.pad(x_c, ((0, pad_rows), (0, pad_k)))
        else:
            x_p = x_c
        w_p = w_c if pad_k == 0 else jnp.pad(w_c, ((0, 0), (0, pad_k)))

        if jnp.dtype(out_dtype) == jnp.dtype(jnp.float32):
            kernel = _ktiled_inplace_kernel
            scratch = []
        else:
            kernel = _ktiled_scratch_kernel
            scratch = [pltpu.VMEM((tm_eff, C), jnp.float32)]

        # TODO(synk): add an N (output-feature) tile axis for very wide C
        # (>= ~4-8K) so the (C, tk) weight block stays within v7x VMEM.
        out_p = pl.pallas_call(
            kernel,
            out_shape=jax.ShapeDtypeStruct((B_pad, C), out_dtype),
            grid_spec=pltpu.PrefetchScalarGridSpec(
                num_scalar_prefetch=0,
                grid=(B_pad // tm_eff, E_pad // tk_eff),
                in_specs=[
                    pl.BlockSpec((tm_eff, tk_eff), lambda i, k: (i, k)),
                    pl.BlockSpec((C, tk_eff), lambda i, k: (0, k)),
                    pl.BlockSpec((1, C), lambda i, k: (0, 0)),
                ],
                out_specs=pl.BlockSpec((tm_eff, C), lambda i, k: (i, 0)),
                scratch_shapes=scratch,
            ),
            compiler_params=pltpu.CompilerParams(
                dimension_semantics=("parallel", "arbitrary"),
                vmem_limit_bytes=vmem_limit_bytes,
            ),
            cost_estimate=cost,
        )(x_p, w_p, b_c)

    return out_p if B_pad == B else out_p[:B]


if __name__ == "__main__":
    # Small shapes consistent with the module: a batch of flattened embeddings.
    BATCH = 16
    EMBEDDING_SIZE = 32
    COMMON_SIZE = 32

    key = jax.random.PRNGKey(0)
    kx, kw, kb = jax.random.split(key, 3)

    # Same parameter shapes as nn.Linear(EMBEDDING_SIZE, COMMON_SIZE):
    #   weight: (COMMON_SIZE, EMBEDDING_SIZE), bias: (COMMON_SIZE,)
    x = jax.random.normal(kx, (BATCH, EMBEDDING_SIZE), dtype=jnp.float32)
    weight = jax.random.normal(
        kw, (COMMON_SIZE, EMBEDDING_SIZE), dtype=jnp.float32
    ) * 0.1
    bias = jax.random.normal(kb, (COMMON_SIZE,), dtype=jnp.float32) * 0.1

    ref = jnp.abs(x @ weight.T + bias)

    # 1) Resident-weight fast path (exact f32 math).
    out = jax.block_until_ready(image_encoder(x, weight, bias))
    assert out.shape == (BATCH, COMMON_SIZE)
    assert jnp.allclose(out, ref, atol=1e-5, rtol=1e-5)

    # 2) K-tiled accumulator fallback (forced via a 0 resident budget).
    out2 = jax.block_until_ready(
        image_encoder(x, weight, bias, vmem_resident_budget_bytes=0)
    )
    assert jnp.allclose(out2, ref, atol=1e-5, rtol=1e-5)

    # 3) bf16 compute path (f32 accumulation + f32 epilogue) — loose tolerance.
    out3 = jax.block_until_ready(
        image_encoder(x, weight, bias, compute_dtype=jnp.bfloat16)
    )
    assert out3.shape == (BATCH, COMMON_SIZE)
    assert jnp.allclose(out3, ref, atol=5e-2, rtol=5e-2)

    print("KERNEL_OK")
</pallas_src>

<mosaic_0001>
module attributes {stable_mosaic.version = 11 : i64} {
  func.func @_resident_kernel(%arg0: i32, %arg1: memref<8x32xf32, #tpu.memory_space<vmem>>, %arg2: memref<32x32xf32, #tpu.memory_space<vmem>>, %arg3: memref<1x32xf32, #tpu.memory_space<vmem>>, %arg4: memref<8x32xf32, #tpu.memory_space<vmem>>) attributes {dimension_semantics = [#tpu.dimension_semantics<parallel>], iteration_bounds = array<i64: 2>, scalar_prefetch = 0 : i64, scratch_operands = 0 : i64, tpu.core_type = #tpu.core_type<tc>, window_params = [{transform_indices = @transform_0, window_bounds = array<i64: 8, 32>}, {pipeline_mode = #tpu.pipeline_mode<synchronous>, transform_indices = @transform_1, window_bounds = array<i64: 32, 32>}, {pipeline_mode = #tpu.pipeline_mode<synchronous>, transform_indices = @transform_2, window_bounds = array<i64: 1, 32>}, {transform_indices = @transform_3, window_bounds = array<i64: 8, 32>}]} {
    %c0 = arith.constant 0 : index
    %c0_0 = arith.constant 0 : index
    %0 = vector.load %arg1[%c0, %c0_0] : memref<8x32xf32, #tpu.memory_space<vmem>>, vector<8x32xf32>
    %c0_1 = arith.constant 0 : index
    %c0_2 = arith.constant 0 : index
    %1 = vector.load %arg2[%c0_1, %c0_2] : memref<32x32xf32, #tpu.memory_space<vmem>>, vector<32x32xf32>
    %cst = arith.constant dense<0.000000e+00> : vector<8x32xf32>
    %2 = tpu.matmul %0, %1, %cst {dimension_numbers = #tpu.dot_dimension_numbers<[1], [1], [0], [0], [0, 0, 1, 0], [], []>} : vector<8x32xf32>, vector<32x32xf32>, vector<8x32xf32> -> vector<8x32xf32>
    %c0_3 = arith.constant 0 : index
    %c0_4 = arith.constant 0 : index
    %3 = vector.load %arg3[%c0_3, %c0_4] : memref<1x32xf32, #tpu.memory_space<vmem>>, vector<1x32xf32>
    %4 = vector.broadcast %3 : vector<1x32xf32> to vector<8x32xf32>
    %5 = arith.addf %2, %4 : vector<8x32xf32>
    %6 = math.absf %5 : vector<8x32xf32>
    %c0_5 = arith.constant 0 : index
    %c0_6 = arith.constant 0 : index
    %7 = vector.load %arg4[%c0_5, %c0_6] : memref<8x32xf32, #tpu.memory_space<vmem>>, vector<8x32xf32>
    tpu.vector_store %arg4[%c0_5, %c0_6], %6 {strides = array<i32>} : memref<8x32xf32, #tpu.memory_space<vmem>>, vector<8x32xf32>,
    return
  }
  func.func @transform_0(%arg0: i32) -> (i32, i32) {
    %c0_i32 = arith.constant 0 : i32
    %c0_i32_0 = arith.constant 0 : i32
    return %arg0, %c0_i32 : i32, i32
  }
  func.func @transform_1(%arg0: i32) -> (i32, i32) {
    %c0_i32 = arith.constant 0 : i32
    %c0_i32_0 = arith.constant 0 : i32
    %c0_i32_1 = arith.constant 0 : i32
    return %c0_i32, %c0_i32_0 : i32, i32
  }
  func.func @transform_2(%arg0: i32) -> (i32, i32) {
    %c0_i32 = arith.constant 0 : i32
    %c0_i32_0 = arith.constant 0 : i32
    %c0_i32_1 = arith.constant 0 : i32
    return %c0_i32, %c0_i32_0 : i32, i32
  }
  func.func @transform_3(%arg0: i32) -> (i32, i32) {
    %c0_i32 = arith.constant 0 : i32
    %c0_i32_0 = arith.constant 0 : i32
    return %arg0, %c0_i32 : i32, i32
  }
}

</mosaic_0001>

<bundles_post_ra>
// kernel: tpu_custom_call.1
= control target key start
LH: loop header
LB: loop body
LE: loop exit
PB: predicated region body
PF: predicated region fallthrough
CT: control target
= control target key end

     0   :  { %8 = vsyncpa [#allocation3], 0  ;;  %s806_s0 = inlined_call_operand.hbm [shape: f32[16,32], index: 0, kind: input, shape index: {}]   ;;  %s807_s1 = inlined_call_operand.hbm [shape: f32[32,32], index: 1, kind: input, shape index: {}]   ;;  %s808_s2 = inlined_call_operand.vmem [shape: f32[1,32], index: 2, kind: input, shape index: {}]   ;;  %s809_s3 = inlined_call_operand.hbm [shape: f32[16,32], index: 3, kind: output, shape index: {}]  }
   0x1   :  { %10 = vsyncpa [#allocation3 + $0x1], 0 }
   0x2   :  { %11 = vsyncpa [#allocation6], 0 }
   0x3   :  { %12 = vsyncpa [#allocation4], 0 }
   0x4   :  { %14 = vsyncpa [#allocation4 + $0x1], 0  ;;  %s643_s12 = smov 0   ;;  %s645_s13 = smov 0  }
   0x5   :  { %s647_s14 = smov 0   ;;  %s649_s15 = smov 0  }
   0x6 LB: > { %s664_s16 = sadd.s32 4294967295, %s614_s15   ;;  %s395_s17 = sadd.s32 4294967294, %s614_s15   ;;  %s614_s15 = sphi %s649_s15, %s831_s15   ;;  %s610_s14 = sphi %s647_s14, %s830_s14   ;;  %s606_s13 = sphi %s645_s13, %s829_s13   ;;  %s602_s12 = sphi %s643_s12, %s828_s12  }
   0x7   : > { %p40_p0 = scmp.ne.s32.totalorder %s606_s13, %s602_s12  ;;  %p810_p1 = scmp.eq.s32.totalorder %s664_s16, 0 }
   0x8   : > { %p112_p3 = scmp.eq.s32.totalorder %s395_s17, 1  ;;  %p396_p5 = scmp.ge.s32.totalorder %s614_s15, 1 }
   0x9   : > { %p673_p4 = por %p810_p1, %p40_p0  ;;  %p119_p7 = scmp.lt.s32.totalorder %s614_s15, 3 }
   0xa   : > { %p678_p6 = por %p112_p3, %p40_p0  ;;  %s616_s21 = smov [#allocation5]  }
   0xb   : > { %s814_s18 = scalar_select %p673_p4, 1, 0 }
   0xc   : > { %s815_s19 = scalar_select %p678_p6, 1, 0 }
   0xd   : > { %p683_p8 = pnand %p396_p5, %p119_p7  ;;  %s131_s22 = sshll.u32 %s616_s21, 4  ;;  %s132_s22 = int_to_ptr.vmem [resolvable:$true] %s131_s22 }
   0xe   : > { %s697_s24 = sadd.s32 1, %s614_s15   ;;  %s27_s25 = sadd.s32 1, %s610_s14 }
   0xf   : > { %s816_s20 = scalar_select %p683_p8, 1, 0 }
  0x10   : > { %p439_p9 = pneg %p683_p8  ;;  %s24_s26 = ssub.s32 %s614_s15, %s697_s24 }
  0x11   : > { %s503_s27 = scalar_lea.vmem %s132_s22, 512  ;;  %p511_p5 = scmp.lt.s32.totalorder %s132_s22, %s132_s22 }
  0x12   : > { %p692_p11 = pnand %p439_p9, %p810_p1  ;;  %p504_p13 = scmp.ne.s32.totalorder %s132_s22, %s503_s27 }
  0x13   : > { %p512_p7 = scmp.lt.s32.totalorder %s503_s27, %s503_s27 }
  0x14   : > { %p494_p12 = pneg %p692_p11 }
  0x15   : > { %p513_p10 = por %p512_p7, %p511_p5 }
  0x16   : > { %p506_p0 = pnand %p504_p13, %p494_p12 }
  0x18   : > { %p507_p3 = pneg %p506_p0 }
  0x1a   : > { %p514_p2 = pnand %p513_p10, %p507_p3 }
  0x1c   : > { %517 = shalt.err (!%p514_p2)
}
  0x1d   : > { %s617_s28 = smov 128   ;;  %s618_s29 = smov 8  }
  0x1e   : > { %442 = dma.hbm_to_vmem [thread:$0]  (!%p692_p11), %s807_s1, 512, %s132_s22, [#allocation6], %s617_s28, %s617_s28, %s618_s29  }
  0x1f   : > { %p25_p9 = scmp.eq.s32.totalorder %s24_s26, 0  ;;  %p34_p12 = scmp.ne.s32.totalorder %s610_s14, %s606_s13 }
  0x20   : > { %p35_p10 = scmp.eq.s32.totalorder %s614_s15, 0  ;;  %p452_p2 = scmp.lt.s32.totalorder %s614_s15, 2 }
  0x21   : > { %s714_s5 = scalar_select %p25_p9, %s610_s14, %s27_s25  }
  0x22   : > { %p36_p13 = por %p35_p10, %p34_p12  ;;  %p818_p0 = scmp.eq.s32.totalorder %s664_s16, 1 }
  0x23   : > { %s148_s7 = sand.u32 1, %s610_s14   ;;  %s400_s8 = sshll.u32 %s614_s15, 7 }
  0x24   : > { %p718_p3 = por %p818_p0, %p34_p12  ;;  %s399_s9 = sshll.u32 %s148_s7, 3 }
  0x25   : > { %s727_s17 = scalar_lea.hbm %s806_s0, %s400_s8  ;;  %s152_s21 = scalar_lea.vmem [#allocation2], %s399_s9 }
  0x26   : > { %s819_s6 = scalar_select %p718_p3, 1, 0 }
  0x27   : > { %s159_s22 = sshll.u32 %s152_s21, 4  ;;  %p729_p11 = pnand %p452_p2, %p36_p13  ;;  %s160_s22 = int_to_ptr.vmem [resolvable:$true] %s159_s22 }
  0x28   : > { %s149_s25 = scalar_lea.sflag [#allocation3], %s148_s7  ;;  %s518_s26 = scalar_lea.hbm %s727_s17, 128 }
  0x29   : > { %p519_p5 = scmp.ne.s32.totalorder %s727_s17, %s518_s26  ;;  %p520_p7 = pneg %p729_p11 }
  0x2a   : > { %s523_s29 = scalar_lea.hbm %s806_s0, 256  ;;  %p524_p10 = scmp.lt.s32.totalorder %s727_s17, %s806_s0 }
  0x2b   : > { %p521_p9 = pnand %p520_p7, %p519_p5  ;;  %p525_p2 = scmp.lt.s32.totalorder %s523_s29, %s518_s26 }
  0x2d   : > { %p522_p12 = pneg %p521_p9  ;;  %p526_p13 = por %p525_p2, %p524_p10 }
  0x2f   : > { %p527_p0 = pnand %p526_p13, %p522_p12 }
  0x31   : > { %530 = shalt.err (!%p527_p0)
}
  0x32   : > { %s531_s8 = scalar_lea.vmem %s160_s22, 128  ;;  %s619_s7 = smov [#allocation2]  }
  0x33   : > { %p532_p1 = scmp.ne.s32.totalorder %s160_s22, %s531_s8  ;;  %s536_s9 = sshll.u32 %s619_s7, 4  ;;  %s537_s9 = int_to_ptr.vmem [resolvable:$false] %s536_s9 }
  0x34   : > { %s538_s10 = scalar_lea.vmem %s537_s9, 256  ;;  %p539_p5 = scmp.lt.s32.totalorder %s160_s22, %s537_s9 }
  0x35   : > { %p534_p6 = pnand %p532_p1, %p520_p7  ;;  %p540_p9 = scmp.lt.s32.totalorder %s538_s10, %s531_s8 }
  0x37   : > { %p535_p3 = pneg %p534_p6  ;;  %p541_p4 = por %p540_p9, %p539_p5 }
  0x39   : > { %p542_p8 = pnand %p541_p4, %p535_p3 }
  0x3b   : > { %545 = shalt.err (!%p542_p8)
}
  0x3c   : > { %446 = dma.hbm_to_vmem [thread:$0]  (!%p729_p11), %s727_s17, 128, %s160_s22, %s149_s25  }
  0x3d   : > { %p821_p12 = scmp.ne.s32.totalorder %s816_s20, 0 }
  0x3e   : > { %s750_s11 = sand.u32 (!%p821_p12), 1, %s606_s13   ;;  %p822_p1 = scmp.ne.s32.totalorder (!%p821_p12), %s814_s18, 0 }
  0x3f   : > { %168 = sbr.rel (%p821_p12) target bundleno = 299 (0x12b), region = 32  ;;  %s402_s21 = sshll.u32 (!%p821_p12), %s750_s11, 3 }
  0x40   : > { %s171_s26 = scalar_lea.sflag (!%p821_p12), [#allocation3], %s750_s11  ;;  %s174_s27 = scalar_lea.vmem (!%p821_p12), [#allocation2], %s402_s21 }
  0x44   : > { %589 = dma.done.wait (%p822_p1), %s171_s26, 128  }
  0x45   : > { %591 = vsyncadd (%p822_p1), %s171_s26, 4294967168  ;;  %p823_p4 = scmp.eq.s32.totalorder %s664_s16, 0 }
  0x47   : > { %593 = dma.done.wait (%p823_p4), [#allocation6], 512   ;;  %p824_p6 = pmov %p823_p4 }
  0x48   : > { %v620_v0 = vmov 0.0   ;;  %vm621_vm0 = vmmov 0   ;;  %vm213_vm1 = vcmask 261120   ;;  %v205_v1 = vld [vmem:[#allocation5 + $0x18] sm:$0xff]  ;;  %v204_v2 = vld [vmem:[#allocation5 + $0x10] sm:$0xff]  ;;  %v203_v3 = vld [vmem:[#allocation5 + $0x8] sm:$0xff] }
  0x49   : > { %595 = vsyncadd (%p824_p6), [#allocation6], 4294966784  ;;  %420 = vmatprep.subr.mxu0 %v620_v0  ;;  %428 = vmatprep.mubr.msk.f32.mxu0 %vm621_vm0, %v620_v0  ;;  %v202_v4 = vld [vmem:[#allocation5] sm:$0xff]  ;;  %v201_v5 = vld [vmem:[%s174_s27] sm:$0xff]  ;;  %s412_s17 = sshll.u32 %s664_s16, 7  ;;  %s200_s22 = scalar_lea.vmem [#allocation7], %s402_s21 }
  0x4a   : > { %421 = vmatpush3.xpose.msk.msra.mxu0 %vm213_vm1, %v205_v1  ;;  %v405_v6 = vld [vmem:[%s808_s2] ss:$0 sm:$0xff]  ;;  %s315_s23 = sshll.u32 %s200_s22, 4  ;;  %s313_s29 = scalar_lea.hbm %s809_s3, %s412_s17  ;;  %s316_s23 = int_to_ptr.vmem [resolvable:$true] %s315_s23 }
  0x4b   : > { %422 = vmatprep.subr.mxu0 %v620_v0  ;;  %s302_s30 = scalar_lea.sflag [#allocation4], %s750_s11  ;;  %s546_s4 = scalar_lea.vmem %s316_s23, 128 }
  0x4c   : > { %p547_p8 = scmp.ne.s32.totalorder %s316_s23, %s546_s4  ;;  %p825_p3 = scmp.ne.s32.totalorder %s819_s6, 0 }
  0x4d   : > { %s622_s8 = smov [#allocation7]  }
  0x4e   : > { %423 = vmatpush3.xpose.msk.msra.mxu0 %vm213_vm1, %v204_v2  ;;  %p548_p11 = pnand %p547_p8, %p825_p3  ;;  %s550_s16 = sshll.u32 %s622_s8, 4  ;;  %s551_s16 = int_to_ptr.vmem [resolvable:$false] %s550_s16 }
  0x4f   : > { %424 = vmatprep.subr.mxu0 %v620_v0  ;;  %s552_s7 = scalar_lea.vmem %s551_s16, 256  ;;  %p553_p10 = scmp.lt.s32.totalorder %s316_s23, %s551_s16 }
  0x50   : > { %p549_p7 = pneg %p548_p11  ;;  %p554_p2 = scmp.lt.s32.totalorder %s552_s7, %s546_s4 }
  0x52   : > { %425 = vmatpush3.xpose.msk.msra.mxu0 %vm213_vm1, %v203_v3  ;;  %p555_p13 = por %p554_p2, %p553_p10 }
  0x53   : > { %426 = vmatprep.subr.mxu0 %v620_v0 }
  0x54   : > { %p556_p0 = pnand %p555_p13, %p549_p7 }
  0x56   : > { %427 = vmatpush3.xpose.msk.msra.mxu0 %vm213_vm1, %v202_v4 }
  0x59   : > { %429 = vmatmul.mubr.msk.f32.vlgmr.msra.gmra.mxu0 %vm213_vm1, %v201_v5 }
 0x119   : > { %v295_v7 = vpop.f32.mrf.mxu0 }
 0x11a   : > { %v296_v8 = vadd.f32 %v405_v6, %v295_v7 }
 0x11b   : > { %v430_v9 = vpop.f32.mrf.mxu0 }
 0x11c   : > { %v299_v10 = vand.u32 2147483647, %v296_v8 }
 0x11e   : > { %300 = vst.msk [vmem:[%s200_s22] sm:$0xff] %vm213_vm1, %v299_v10 }
 0x11f   : > { %559 = shalt.err (!%p556_p0)
}
 0x120   : > { %s560_s9 = scalar_lea.hbm %s313_s29, 128  ;;  %s564_s21 = scalar_lea.hbm %s809_s3, 256 }
 0x121   : > { %p561_p5 = scmp.ne.s32.totalorder %s313_s29, %s560_s9  ;;  %p565_p1 = scmp.lt.s32.totalorder %s313_s29, %s809_s3 }
 0x122   : > { %p566_p4 = scmp.lt.s32.totalorder %s564_s21, %s560_s9 }
 0x123   : > { %p562_p9 = pnand %p561_p5, %p825_p3 }
 0x124   : > { %p567_p6 = por %p566_p4, %p565_p1 }
 0x125   : > { %p563_p12 = pneg %p562_p9 }
 0x127   : > { %p568_p8 = pnand %p567_p6, %p563_p12 }
 0x129   : > { %571 = shalt.err (!%p568_p8)
}
 0x12a   : > { %437 = dma.vmem_to_hbm [thread:$0]  (%p825_p3), %s316_s23, 128, %s313_s29, %s302_s30  }
 0x12b PF: > { %s327_s18 = sand.u32 1, %s602_s12   ;;  %p826_p11 = scmp.ne.s32.totalorder %s815_s19, 0 }
 0x12c   : > { %p827_p7 = scmp.ge.s32.totalorder %s614_s15, 2  ;;  %s328_s20 = scalar_lea.sflag [#allocation4], %s327_s18 }
 0x12e   : > { %p448_p10 = pnand %p827_p7, %p826_p11 }
 0x130   : > { %p449_p2 = pneg %p448_p10 }
 0x132   : > { %597 = dma.done.wait (%p449_p2), %s328_s20, 128  }
 0x133   : > { %599 = vsyncadd (%p449_p2), %s328_s20, 4294967168  ;;  %p17_p13 = scmp.ge.s32.totalorder %s697_s24, 4   ;;  %s828_s12 = smov %s606_s13 }
 0x134   : > { %s829_s13 = smov %s610_s14  ;;  %s830_s14 = smov %s714_s5 }
 0x135   : > { %s831_s15 = smov %s697_s24  ;;  %19 = sbr.rel (!%p17_p13) target bundleno = 6 (0x6), region = 81 }
 0x13a   :  { %333 = vsyncpa [#allocation3], 1 }
 0x13b   :  { %335 = vsyncpa [#allocation3 + $0x1], 1 }
 0x13c   :  { %336 = vsyncpa [#allocation6], 1 }
 0x13d   :  { %337 = vsyncpa [#allocation4], 1 }
 0x13e   :  { %339 = vsyncpa [#allocation4 + $0x1], 1 }

</bundles_post_ra>
